<compile_context>
chip_gen: v7x
topology: tpu7x:2x2x1
jax: 0.10.0
libtpu: 0.0.40
codegen_flags: <defaults>
</compile_context>

<pallas_src>
import numpy as np
import jax
import jax.numpy as jnp
from jax import lax
from jax.experimental import pallas as pl
from jax.experimental.pallas import tpu as pltpu


def _sepconv_kernel(x_ref, wa_ref, wg_ref, o_ref):
    # x_ref : (1, 9*Cin, (D+2)*HW)  im2col'd, depth-zero-padded input, HW on lanes
    # wa_ref: (3, Cout, 9*Cin)      fused (w2_value[kd] @ w1) weights
    # wg_ref: (3, Cout, 9*Cin)      fused (w2_gate[kd]  @ w1) weights
    # o_ref : (1, Cout, D*HW)       gated output, lane-dense
    cout = o_ref.shape[1]
    dhw = o_ref.shape[2]
    hw = (x_ref.shape[2] - dhw) // 2

    a = jnp.zeros((cout, dhw), jnp.float32)
    g = jnp.zeros((cout, dhw), jnp.float32)
    # 3 depth taps of the (3,1,1) conv: each tap is a single big matmul covering
    # every depth slice at once; the depth shift is a static, 128-aligned lane
    # slice of the depth-padded slab (HW is a multiple of 128).
    for kd in range(3):
        xk = x_ref[0, :, pl.ds(kd * hw, dhw)]   # (9*Cin, D*HW), native dtype
        a = a + jnp.dot(wa_ref[kd], xk, preferred_element_type=jnp.float32)
        g = g + jnp.dot(wg_ref[kd], xk, preferred_element_type=jnp.float32)

    o_ref[0] = (a * jax.nn.sigmoid(g)).astype(o_ref.dtype)


def sepconv_dp_ca(x, w1, w2):
    """x: (N, Cin, D, H, W); w1: (Cout, Cin, 1, 3, 3); w2: (2*Cout, Cout, 3, 1, 1)."""
    N, Cin, D, H, W = x.shape
    Cout = w1.shape[0]
    HW = H * W
    assert HW % 128 == 0, "H*W must be a multiple of 128 for aligned lane slicing"

    # ---- glue: spatial im2col + depth zero-pad, channels-on-sublanes layout ----
    # TODO(synk): the im2col inflates input HBM reads 9x; for large memory-bound
    # production shapes, do the 3x3 spatial conv in-kernel with shifted-slice
    # matmuls over a padded (H+2)*(W+2) lane grid instead.
    xp = jnp.pad(x, ((0, 0), (0, 0), (1, 1), (1, 1), (1, 1)))   # (N,Cin,D+2,H+2,W+2)
    taps = [xp[:, :, :, kh:kh + H, kw:kw + W] for kh in range(3) for kw in range(3)]
    xcol = jnp.stack(taps, axis=1)                    # (N, 9, Cin, D+2, H, W)
    xflat = xcol.reshape(N, 9 * Cin, (D + 2) * HW)    # lanes = depth-padded D*HW

    # ---- glue: fuse the two conv weights:  wc[kd] = w2[:, :, kd] @ w1_flat ----
    # w1t[co, (kh*3+kw)*Cin + ci] = w1[co, ci, 0, kh, kw]
    w1t = jnp.transpose(w1[:, :, 0], (0, 2, 3, 1)).reshape(Cout, 9 * Cin)
    # w2t[kd, c2, co] = w2[c2, co, kd, 0, 0]
    w2t = jnp.transpose(w2[:, :, :, 0, 0], (2, 0, 1))            # (3, 2*Cout, Cout)
    wc = jnp.einsum("kco,oj->kcj", w2t, w1t)                     # (3, 2*Cout, 9*Cin)
    wa = wc[:, :Cout, :]     # first half of chunk(., 2, dim=1) -> value
    wg = wc[:, Cout:, :]     # second half                      -> gate

    # TODO(synk): for production HSDT shapes (H,W>=64, D>=16, Cin>=16) add a
    # grid axis over D / HW (depth halo via extra shifted in_specs) so blocks
    # stay within v7x's 64 MiB VMEM and N=1 still fills both TensorCores.
    out = pl.pallas_call(
        _sepconv_kernel,
        out_shape=jax.ShapeDtypeStruct((N, Cout, D * HW), x.dtype),
        grid_spec=pltpu.PrefetchScalarGridSpec(
            num_scalar_prefetch=0,
            grid=(N,),
            in_specs=[
                pl.BlockSpec((1, 9 * Cin, (D + 2) * HW), lambda n: (n, 0, 0)),
                pl.BlockSpec((3, Cout, 9 * Cin), lambda n: (0, 0, 0)),
                pl.BlockSpec((3, Cout, 9 * Cin), lambda n: (0, 0, 0)),
            ],
            out_specs=pl.BlockSpec((1, Cout, D * HW), lambda n: (n, 0, 0)),
        ),
        compiler_params=pltpu.CompilerParams(
            dimension_semantics=("parallel",),
            # explicit budget (blocks here use < 2 MiB); safe on v5e/v6e/v7x
            vmem_limit_bytes=32 * 1024 * 1024,
        ),
    )(xflat, wa, wg)

    # (N, Cout, D*HW) -> NCDHW is a free reshape (no transpose needed).
    return out.reshape(N, Cout, D, H, W)


def ref_forward(x, w1, w2):
    """Pure-JAX reference matching the PyTorch module."""
    dn1 = lax.conv_dimension_numbers(x.shape, w1.shape, ("NCDHW", "OIDHW", "NCDHW"))
    y = lax.conv_general_dilated(
        x, w1, (1, 1, 1), [(0, 0), (1, 1), (1, 1)], dimension_numbers=dn1
    )
    dn2 = lax.conv_dimension_numbers(y.shape, w2.shape, ("NCDHW", "OIDHW", "NCDHW"))
    z = lax.conv_general_dilated(
        y, w2, (1, 1, 1), [(1, 1), (0, 0), (0, 0)], dimension_numbers=dn2
    )
    a, g = jnp.split(z, 2, axis=1)
    return a * jax.nn.sigmoid(g)


if __name__ == "__main__":
    # small shapes consistent with the module's forward (3D conv input NCDHW)
    N, Cin, Cout, D, H, W = 2, 4, 8, 8, 16, 16

    key = jax.random.PRNGKey(0)
    kx, k1, k2 = jax.random.split(key, 3)
    x = jax.random.normal(kx, (N, Cin, D, H, W), dtype=jnp.float32)
    # deterministic synthetic weights (dw_conv / pw_conv of SepConv_DP_CA, bias=False)
    w1 = jax.random.normal(k1, (Cout, Cin, 1, 3, 3), dtype=jnp.float32) * 0.1
    w2 = jax.random.normal(k2, (2 * Cout, Cout, 3, 1, 1), dtype=jnp.float32) * 0.1

    out = jax.jit(sepconv_dp_ca)(x, w1, w2)
    out = jax.block_until_ready(out)

    ref = ref_forward(x, w1, w2)
    np.testing.assert_allclose(np.asarray(out), np.asarray(ref), atol=2e-3, rtol=2e-3)
    assert out.shape == (N, Cout, D, H, W)

    print("KERNEL_OK")
</pallas_src>

<mosaic_0001>
module attributes {stable_mosaic.version = 11 : i64} {
  func.func @_sepconv_kernel(%arg0: i32, %arg1: memref<1x36x2560xf32, #tpu.memory_space<vmem>>, %arg2: memref<3x8x36xf32, #tpu.memory_space<vmem>>, %arg3: memref<3x8x36xf32, #tpu.memory_space<vmem>>, %arg4: memref<1x8x2048xf32, #tpu.memory_space<vmem>>) attributes {dimension_semantics = [#tpu.dimension_semantics<parallel>], iteration_bounds = array<i64: 2>, scalar_prefetch = 0 : i64, scratch_operands = 0 : i64, tpu.core_type = #tpu.core_type<tc>, window_params = [{transform_indices = @transform_0, window_bounds = array<i64: 1, 36, 2560>}, {pipeline_mode = #tpu.pipeline_mode<synchronous>, transform_indices = @transform_1, window_bounds = array<i64: 3, 8, 36>}, {pipeline_mode = #tpu.pipeline_mode<synchronous>, transform_indices = @transform_2, window_bounds = array<i64: 3, 8, 36>}, {transform_indices = @transform_3, window_bounds = array<i64: 1, 8, 2048>}]} {
    %cst = arith.constant 0.000000e+00 : f32
    %0 = vector.broadcast %cst : f32 to vector<8x2048xf32>
    %cst_0 = arith.constant 0.000000e+00 : f32
    %1 = vector.broadcast %cst_0 : f32 to vector<8x2048xf32>
    %c0 = arith.constant 0 : index
    %c0_1 = arith.constant 0 : index
    %c0_2 = arith.constant 0 : index
    %2 = vector.load %arg1[%c0, %c0_1, %c0_2] : memref<1x36x2560xf32, #tpu.memory_space<vmem>>, vector<1x36x2048xf32>
    %3 = vector.shape_cast %2 : vector<1x36x2048xf32> to vector<36x2048xf32>
    %c0_3 = arith.constant 0 : index
    %c0_4 = arith.constant 0 : index
    %c0_5 = arith.constant 0 : index
    %4 = vector.load %arg2[%c0_3, %c0_4, %c0_5] : memref<3x8x36xf32, #tpu.memory_space<vmem>>, vector<1x8x36xf32>
    %5 = vector.shape_cast %4 : vector<1x8x36xf32> to vector<8x36xf32>
    %cst_6 = arith.constant dense<0.000000e+00> : vector<8x2048xf32>
    %6 = tpu.matmul %5, %3, %cst_6 {dimension_numbers = #tpu.dot_dimension_numbers<[1], [0], [0], [1], [0, 0, 1, 1], [], []>} : vector<8x36xf32>, vector<36x2048xf32>, vector<8x2048xf32> -> vector<8x2048xf32>
    %7 = arith.addf %0, %6 : vector<8x2048xf32>
    %c0_7 = arith.constant 0 : index
    %c0_8 = arith.constant 0 : index
    %c0_9 = arith.constant 0 : index
    %8 = vector.load %arg3[%c0_7, %c0_8, %c0_9] : memref<3x8x36xf32, #tpu.memory_space<vmem>>, vector<1x8x36xf32>
    %9 = vector.shape_cast %8 : vector<1x8x36xf32> to vector<8x36xf32>
    %cst_10 = arith.constant dense<0.000000e+00> : vector<8x2048xf32>
    %10 = tpu.matmul %9, %3, %cst_10 {dimension_numbers = #tpu.dot_dimension_numbers<[1], [0], [0], [1], [0, 0, 1, 1], [], []>} : vector<8x36xf32>, vector<36x2048xf32>, vector<8x2048xf32> -> vector<8x2048xf32>
    %11 = arith.addf %1, %10 : vector<8x2048xf32>
    %c0_11 = arith.constant 0 : index
    %c0_12 = arith.constant 0 : index
    %c256 = arith.constant 256 : index
    %12 = vector.load %arg1[%c0_11, %c0_12, %c256] : memref<1x36x2560xf32, #tpu.memory_space<vmem>>, vector<1x36x2048xf32>
    %13 = vector.shape_cast %12 : vector<1x36x2048xf32> to vector<36x2048xf32>
    %c1 = arith.constant 1 : index
    %c0_13 = arith.constant 0 : index
    %c0_14 = arith.constant 0 : index
    %14 = vector.load %arg2[%c1, %c0_13, %c0_14] : memref<3x8x36xf32, #tpu.memory_space<vmem>>, vector<1x8x36xf32>
    %15 = vector.shape_cast %14 : vector<1x8x36xf32> to vector<8x36xf32>
    %cst_15 = arith.constant dense<0.000000e+00> : vector<8x2048xf32>
    %16 = tpu.matmul %15, %13, %cst_15 {dimension_numbers = #tpu.dot_dimension_numbers<[1], [0], [0], [1], [0, 0, 1, 1], [], []>} : vector<8x36xf32>, vector<36x2048xf32>, vector<8x2048xf32> -> vector<8x2048xf32>
    %17 = arith.addf %7, %16 : vector<8x2048xf32>
    %c1_16 = arith.constant 1 : index
    %c0_17 = arith.constant 0 : index
    %c0_18 = arith.constant 0 : index
    %18 = vector.load %arg3[%c1_16, %c0_17, %c0_18] : memref<3x8x36xf32, #tpu.memory_space<vmem>>, vector<1x8x36xf32>
    %19 = vector.shape_cast %18 : vector<1x8x36xf32> to vector<8x36xf32>
    %cst_19 = arith.constant dense<0.000000e+00> : vector<8x2048xf32>
    %20 = tpu.matmul %19, %13, %cst_19 {dimension_numbers = #tpu.dot_dimension_numbers<[1], [0], [0], [1], [0, 0, 1, 1], [], []>} : vector<8x36xf32>, vector<36x2048xf32>, vector<8x2048xf32> -> vector<8x2048xf32>
    %21 = arith.addf %11, %20 : vector<8x2048xf32>
    %c0_20 = arith.constant 0 : index
    %c0_21 = arith.constant 0 : index
    %c512 = arith.constant 512 : index
    %22 = vector.load %arg1[%c0_20, %c0_21, %c512] : memref<1x36x2560xf32, #tpu.memory_space<vmem>>, vector<1x36x2048xf32>
    %23 = vector.shape_cast %22 : vector<1x36x2048xf32> to vector<36x2048xf32>
    %c2 = arith.constant 2 : index
    %c0_22 = arith.constant 0 : index
    %c0_23 = arith.constant 0 : index
    %24 = vector.load %arg2[%c2, %c0_22, %c0_23] : memref<3x8x36xf32, #tpu.memory_space<vmem>>, vector<1x8x36xf32>
    %25 = vector.shape_cast %24 : vector<1x8x36xf32> to vector<8x36xf32>
    %cst_24 = arith.constant dense<0.000000e+00> : vector<8x2048xf32>
    %26 = tpu.matmul %25, %23, %cst_24 {dimension_numbers = #tpu.dot_dimension_numbers<[1], [0], [0], [1], [0, 0, 1, 1], [], []>} : vector<8x36xf32>, vector<36x2048xf32>, vector<8x2048xf32> -> vector<8x2048xf32>
    %27 = arith.addf %17, %26 : vector<8x2048xf32>
    %c2_25 = arith.constant 2 : index
    %c0_26 = arith.constant 0 : index
    %c0_27 = arith.constant 0 : index
    %28 = vector.load %arg3[%c2_25, %c0_26, %c0_27] : memref<3x8x36xf32, #tpu.memory_space<vmem>>, vector<1x8x36xf32>
    %29 = vector.shape_cast %28 : vector<1x8x36xf32> to vector<8x36xf32>
    %cst_28 = arith.constant dense<0.000000e+00> : vector<8x2048xf32>
    %30 = tpu.matmul %29, %23, %cst_28 {dimension_numbers = #tpu.dot_dimension_numbers<[1], [0], [0], [1], [0, 0, 1, 1], [], []>} : vector<8x36xf32>, vector<36x2048xf32>, vector<8x2048xf32> -> vector<8x2048xf32>
    %31 = arith.addf %21, %30 : vector<8x2048xf32>
    %32 = arith.negf %31 : vector<8x2048xf32>
    %33 = math.exp %32 : vector<8x2048xf32>
    %cst_29 = arith.constant 1.000000e+00 : f32
    %34 = vector.broadcast %cst_29 : f32 to vector<8x2048xf32>
    %35 = arith.addf %34, %33 : vector<8x2048xf32>
    %36 = arith.divf %34, %35 : vector<8x2048xf32>
    %37 = arith.mulf %27, %36 : vector<8x2048xf32>
    %c0_30 = arith.constant 0 : index
    %c0_31 = arith.constant 0 : index
    %c0_32 = arith.constant 0 : index
    %38 = vector.load %arg4[%c0_30, %c0_31, %c0_32] : memref<1x8x2048xf32, #tpu.memory_space<vmem>>, vector<1x8x2048xf32>
    %39 = vector.shape_cast %38 : vector<1x8x2048xf32> to vector<8x2048xf32>
    %40 = vector.shape_cast %37 : vector<8x2048xf32> to vector<1x8x2048xf32>
    tpu.vector_store %arg4[%c0_30, %c0_31, %c0_32], %40 {strides = array<i32>} : memref<1x8x2048xf32, #tpu.memory_space<vmem>>, vector<1x8x2048xf32>,
    return
  }
  func.func @transform_0(%arg0: i32) -> (i32, i32, i32) {
    %c0_i32 = arith.constant 0 : i32
    %c0_i32_0 = arith.constant 0 : i32
    %c0_i32_1 = arith.constant 0 : i32
    return %arg0, %c0_i32, %c0_i32_0 : i32, i32, i32
  }
  func.func @transform_1(%arg0: i32) -> (i32, i32, i32) {
    %c0_i32 = arith.constant 0 : i32
    %c0_i32_0 = arith.constant 0 : i32
    %c0_i32_1 = arith.constant 0 : i32
    %c0_i32_2 = arith.constant 0 : i32
    return %c0_i32, %c0_i32_0, %c0_i32_1 : i32, i32, i32
  }
  func.func @transform_2(%arg0: i32) -> (i32, i32, i32) {
    %c0_i32 = arith.constant 0 : i32
    %c0_i32_0 = arith.constant 0 : i32
    %c0_i32_1 = arith.constant 0 : i32
    %c0_i32_2 = arith.constant 0 : i32
    return %c0_i32, %c0_i32_0, %c0_i32_1 : i32, i32, i32
  }
  func.func @transform_3(%arg0: i32) -> (i32, i32, i32) {
    %c0_i32 = arith.constant 0 : i32
    %c0_i32_0 = arith.constant 0 : i32
    %c0_i32_1 = arith.constant 0 : i32
    return %arg0, %c0_i32, %c0_i32_0 : i32, i32, i32
  }
}

</mosaic_0001>

<bundles_post_ra>
// kernel: sepconv_dp_ca.1
= control target key start
LH: loop header
LB: loop body
LE: loop exit
PB: predicated region body
PF: predicated region fallthrough
CT: control target
= control target key end

     0   :  { %s4822_s12 = smov 0   ;;  %s5691_s0 = inlined_call_operand.vmem [shape: f32[2,36,2560], index: 0, kind: input, shape index: {}]   ;;  %s5692_s1 = inlined_call_operand.vmem [shape: f32[3,8,36], index: 1, kind: input, shape index: {}]   ;;  %s5693_s2 = inlined_call_operand.vmem [shape: f32[3,8,36], index: 2, kind: input, shape index: {}]   ;;  %s5694_s3 = inlined_call_operand.vmem [shape: f32[2,8,2048], index: 3, kind: output, shape index: {}]  }
   0x1 LB: > { %s4096_s13 = sadd.s32 4294967295, %s4799_s12   ;;  %p4100_p0 = scmp.ge.s32.totalorder %s4799_s12, 1  ;;  %s4799_s12 = sphi %s4822_s12, %s13_s12  }
   0x2   : > { %p137_p1 = scmp.lt.s32.totalorder %s4799_s12, 3 }
   0x4   : > { %p138_p2 = pnand %p4100_p0, %p137_p1 }
   0x5   : > { %p161_p3 = scmp.lt.s32.totalorder (!%p138_p2), %s4096_s13, 1  ;;  %v4801_v0 = vmov (!%p138_p2), 0.0   ;;  %vm269_vm0 = vcmask (!%p138_p2), 1043456   ;;  %v4915_v43 = vld [vmem:[%s5692_s1 + $0x8] sm:$0xff] (!%p138_p2)  ;;  %vm265_vm1 = vcmask (!%p138_p2), 293888  }
   0x6   : > { %141 = sbr.rel (%p138_p2) target bundleno = 530 (0x212), region = 32  ;;  %382 = vmatprep.mubr.f32.mxu0 (!%p138_p2), %v4801_v0  ;;  %453 = vmatprep.mubr.f32.mxu1 (!%p138_p2), %v4801_v0 }
   0xd   : > { %s5696_s13 = smov (!%p161_p3, %s4096_s13), 1 }
   0xe   : > { %s4719_s14 = smul.u32 800, %s5696_s13  ;;  %s4270_s30 = sshll.u32 %s5696_s13, 7 }
   0xf   : > { %s5654_s6 = scalar_lea.vmem %s5694_s3, %s4270_s30 }
  0x10   : > { %s4838_s17 = scalar_lea.vmem %s5691_s0, %s4719_s14 }
  0x11   : > { %v174_v1 = vld [vmem:[%s4838_s17 + $0x18] sm:$0xff]  ;;  %v176_v3 = vld [vmem:[%s4838_s17 + $0x28] sm:$0xff]  ;;  %v173_v6 = vld [vmem:[%s4838_s17 + $0x10] sm:$0xff] }
  0x12   : > { %v190_v2 = vld [vmem:[%s4838_s17 + $0xb8] sm:$0xff]  ;;  %v192_v5 = vld [vmem:[%s4838_s17 + $0xc8] sm:$0xff]  ;;  %v189_v7 = vld [vmem:[%s4838_s17 + $0xb0] sm:$0xff] }
  0x13   : > { %v4843_v4 = vpack.c.bf16 %v190_v2, %v174_v1  ;;  %v4848_v8 = vpack.c.bf16 %v192_v5, %v176_v3  ;;  %v4850_v9 = vpack.c.bf16 %v189_v7, %v173_v6  ;;  %v175_v10 = vld [vmem:[%s4838_s17 + $0x20] sm:$0xff]  ;;  %v206_v12 = vld [vmem:[%s4838_s17 + $0x158] sm:$0xff]  ;;  %v208_v15 = vld [vmem:[%s4838_s17 + $0x168] sm:$0xff] }
  0x14   : > { %v191_v11 = vld [vmem:[%s4838_s17 + $0xc0] sm:$0xff]  ;;  %v222_v14 = vld [vmem:[%s4838_s17 + $0x1f8] sm:$0xff]  ;;  %v224_v16 = vld [vmem:[%s4838_s17 + $0x208] sm:$0xff] }
  0x15   : > { %4272 = vmatprep.subr.bf16.mxu0 %v4843_v4  ;;  %v4856_v13 = vpack.c.bf16 %v191_v11, %v175_v10  ;;  %4280 = vmatprep.subr.bf16.mxu1 %v4848_v8  ;;  %v4863_v17 = vpack.c.bf16 %v222_v14, %v206_v12  ;;  %v4865_v18 = vpack.c.bf16 %v224_v16, %v208_v15  ;;  %v205_v19 = vld [vmem:[%s4838_s17 + $0x150] sm:$0xff]  ;;  %v207_v21 = vld [vmem:[%s4838_s17 + $0x160] sm:$0xff]  ;;  %v4879_v25 = vld [vmem:[%s4838_s17 + $0x298] sm:$0xf] }
  0x16   : > { %4274 = vmatpush1.bf16.msra.mxu0 %v4850_v9  ;;  %v221_v20 = vld [vmem:[%s4838_s17 + $0x1f0] sm:$0xff]  ;;  %v223_v23 = vld [vmem:[%s4838_s17 + $0x200] sm:$0xff]  ;;  %v4882_v26 = vld [vmem:[%s4838_s17 + $0x2a8] sm:$0xf] }
  0x17   : > { %4282 = vmatpush1.bf16.msra.mxu1 %v4856_v13  ;;  %v4871_v22 = vpack.c.bf16 %v221_v20, %v205_v19  ;;  %4276 = vmatprep.subr.bf16.mxu0 %v4863_v17  ;;  %v4876_v24 = vpack.c.bf16 %v223_v23, %v207_v21  ;;  %v178_v27 = vld [vmem:[%s4838_s17 + $0x38] sm:$0xff]  ;;  %v4886_v28 = vld [vmem:[%s4838_s17 + $0x290] sm:$0xf]  ;;  %v180_v30 = vld [vmem:[%s4838_s17 + $0x48] sm:$0xff] }
  0x18   : > { %4284 = vmatprep.subr.bf16.mxu1 %v4865_v18  ;;  %v194_v29 = vld [vmem:[%s4838_s17 + $0xd8] sm:$0xff]  ;;  %v196_v31 = vld [vmem:[%s4838_s17 + $0xe8] sm:$0xff]  ;;  %v177_v32 = vld [vmem:[%s4838_s17 + $0x30] sm:$0xff] }
  0x19   : > { %v193_v33 = vld [vmem:[%s4838_s17 + $0xd0] sm:$0xff]  ;;  %v179_v34 = vld [vmem:[%s4838_s17 + $0x40] sm:$0xff]  ;;  %v4898_v35 = vpack.c.bf16 %v194_v29, %v178_v27  ;;  %v210_v37 = vld [vmem:[%s4838_s17 + $0x178] sm:$0xff]  ;;  %v4908_v40 = vpack.c.bf16 %v196_v31, %v180_v30 }
  0x1a   : > { %4278 = vmatpush1.bf16.msra.mxu0 %v4871_v22  ;;  %v195_v36 = vld [vmem:[%s4838_s17 + $0xe0] sm:$0xff]  ;;  %v226_v38 = vld [vmem:[%s4838_s17 + $0x218] sm:$0xff]  ;;  %v212_v41 = vld [vmem:[%s4838_s17 + $0x188] sm:$0xff]  ;;  %v4917_v44 = vpack.c.bf16 %v193_v33, %v177_v32 }
  0x1b   : > { %4286 = vmatpush1.bf16.msra.mxu1 %v4876_v24  ;;  %4105 = vmatprep.subr.msk.mxu0 %vm269_vm0, %v4879_v25  ;;  %v4906_v39 = vld [vmem:[%s4838_s17 + $0x2a0] sm:$0xf]  ;;  %v228_v42 = vld [vmem:[%s4838_s17 + $0x228] sm:$0xff]  ;;  %v4921_v45 = vpack.c.bf16 %v195_v36, %v179_v34  ;;  %v4923_v46 = vpack.c.bf16 %v226_v38, %v210_v37  ;;  %v209_v47 = vld [vmem:[%s4838_s17 + $0x170] sm:$0xff] }
  0x1c   : > { %4108 = vmatprep.subr.msk.mxu1 %vm269_vm0, %v4882_v26  ;;  %v225_v48 = vld [vmem:[%s4838_s17 + $0x210] sm:$0xff]  ;;  %v4930_v49 = vpack.c.bf16 %v228_v42, %v212_v41  ;;  %v211_v50 = vld [vmem:[%s4838_s17 + $0x180] sm:$0xff]  ;;  %v4947_v54 = vld [vmem:[%s4838_s17 + $0x2b8] sm:$0xf] }
  0x1d   : > { %v227_v51 = vld [vmem:[%s4838_s17 + $0x220] sm:$0xff]  ;;  %v4940_v52 = vpack.c.bf16 %v225_v48, %v209_v47  ;;  %v4951_v55 = vld [vmem:[%s4838_s17 + $0x2c8] sm:$0xf]  ;;  %v182_v56 = vld [vmem:[%s4838_s17 + $0x58] sm:$0xff] }
  0x1e   : > { %4106 = vmatpush1.msk.msra.mxu0 %vm269_vm0, %v4886_v28  ;;  %v4944_v53 = vpack.c.bf16 %v227_v51, %v211_v50  ;;  %v198_v57 = vld [vmem:[%s4838_s17 + $0xf8] sm:$0xff]  ;;  %v4957_v58 = vld [vmem:[%s4838_s17 + $0x2b0] sm:$0xf]  ;;  %v184_v59 = vld [vmem:[%s4838_s17 + $0x68] sm:$0xff] }
  0x1f   : > { %4109 = vmatpush1.msk.msra.mxu1 %vm269_vm0, %v4906_v39  ;;  %4288 = vmatprep.subr.bf16.mxu0 %v4898_v35  ;;  %v200_v60 = vld [vmem:[%s4838_s17 + $0x108] sm:$0xff]  ;;  %v181_v61 = vld [vmem:[%s4838_s17 + $0x50] sm:$0xff]  ;;  %v183_v63 = vld [vmem:[%s4838_s17 + $0x60] sm:$0xff]  ;;  %v4969_v1 = vpack.c.bf16 %v198_v57, %v182_v56 }
  0x20   : > { %4296 = vmatprep.subr.bf16.mxu1 %v4908_v40  ;;  %4107 = vmatmul.mubr.msk.f32.vlgmr.msra.gmra.mrb[0].mxu0 %vm265_vm1, %v4915_v43  ;;  %v197_v62 = vld [vmem:[%s4838_s17 + $0xf0] sm:$0xff]  ;;  %v199_v2 = vld [vmem:[%s4838_s17 + $0x100] sm:$0xff]  ;;  %v214_v3 = vld [vmem:[%s4838_s17 + $0x198] sm:$0xff]  ;;  %v4979_v7 = vpack.c.bf16 %v200_v60, %v184_v59 }
  0x21   : > { %4110 = vmatmul.mubr.msk.f32.vlgmr.msra.gmra.mrb[0].mxu1 %vm265_vm1, %v4915_v43  ;;  %4290 = vmatpush1.bf16.msra.mxu0 %v4917_v44  ;;  %v230_v5 = vld [vmem:[%s4838_s17 + $0x238] sm:$0xff]  ;;  %v4977_v6 = vld [vmem:[%s4838_s17 + $0x2c0] sm:$0xf]  ;;  %v216_v10 = vld [vmem:[%s4838_s17 + $0x1a8] sm:$0xff]  ;;  %v4983_v12 = vpack.c.bf16 %v197_v62, %v181_v61  ;;  %v4987_v14 = vpack.c.bf16 %v199_v2, %v183_v63 }
  0x22   : > { %4298 = vmatpush1.bf16.msra.mxu1 %v4921_v45  ;;  %4292 = vmatprep.subr.bf16.mxu0 %v4923_v46  ;;  %v232_v11 = vld [vmem:[%s4838_s17 + $0x248] sm:$0xff]  ;;  %v4989_v15 = vpack.c.bf16 %v230_v5, %v214_v3  ;;  %v213_v16 = vld [vmem:[%s4838_s17 + $0x190] sm:$0xff]  ;;  %v215_v21 = vld [vmem:[%s4838_s17 + $0x1a0] sm:$0xff] }
  0x23   : > { %4300 = vmatprep.subr.bf16.mxu1 %v4930_v49  ;;  %524 = vmatprep.mubr.f32.mxu0 %v4801_v0  ;;  %v229_v19 = vld [vmem:[%s4838_s17 + $0x230] sm:$0xff]  ;;  %v4996_v20 = vpack.c.bf16 %v232_v11, %v216_v10  ;;  %v231_v23 = vld [vmem:[%s4838_s17 + $0x240] sm:$0xff]  ;;  %v5013_v30 = vld [vmem:[%s4838_s17 + $0x2d8] sm:$0xf] }
  0x24   : > { %595 = vmatprep.mubr.f32.mxu1 %v4801_v0  ;;  %v5006_v27 = vpack.c.bf16 %v229_v19, %v213_v16  ;;  %v5010_v29 = vpack.c.bf16 %v231_v23, %v215_v21  ;;  %v5017_v31 = vld [vmem:[%s4838_s17 + $0x2e8] sm:$0xf]  ;;  %v186_v32 = vld [vmem:[%s4838_s17 + $0x78] sm:$0xff]  ;;  %v5023_v34 = vld [vmem:[%s4838_s17 + $0x2d0] sm:$0xf] }
  0x25   : > { %4294 = vmatpush1.bf16.msra.mxu0 %v4940_v52  ;;  %v202_v33 = vld [vmem:[%s4838_s17 + $0x118] sm:$0xff]  ;;  %v254_v36 = vld [vmem:[%s4838_s17 + $0x88] sm:$0xff]  ;;  %v185_v38 = vld [vmem:[%s4838_s17 + $0x70] sm:$0xff] }
  0x26   : > { %4302 = vmatpush1.bf16.msra.mxu1 %v4944_v53  ;;  %4111 = vmatprep.subr.msk.mxu0 %vm269_vm0, %v4947_v54  ;;  %v256_v37 = vld [vmem:[%s4838_s17 + $0x128] sm:$0xff]  ;;  %v201_v41 = vld [vmem:[%s4838_s17 + $0x110] sm:$0xff]  ;;  %v253_v42 = vld [vmem:[%s4838_s17 + $0x80] sm:$0xff]  ;;  %v5035_v47 = vpack.c.bf16 %v202_v33, %v186_v32 }
  0x27   : > { %4114 = vmatprep.subr.msk.mxu1 %vm269_vm0, %v4951_v55  ;;  %v255_v48 = vld [vmem:[%s4838_s17 + $0x120] sm:$0xff]  ;;  %v218_v50 = vld [vmem:[%s4838_s17 + $0x1b8] sm:$0xff]  ;;  %v5045_v57 = vpack.c.bf16 %v256_v37, %v254_v36  ;;  %v258_v59 = vld [vmem:[%s4838_s17 + $0x1c8] sm:$0xff]  ;;  %v5049_v61 = vpack.c.bf16 %v201_v41, %v185_v38 }
  0x28   : > { %v234_v51 = vld [vmem:[%s4838_s17 + $0x258] sm:$0xff]  ;;  %v5043_v56 = vld [vmem:[%s4838_s17 + $0x2e0] sm:$0xf]  ;;  %v260_v60 = vld [vmem:[%s4838_s17 + $0x268] sm:$0xff]  ;;  %v5053_v62 = vpack.c.bf16 %v255_v48, %v253_v42 }
  0x29   : > { %4112 = vmatpush1.msk.msra.mxu0 %vm269_vm0, %v4957_v58  ;;  %v5055_v63 = vpack.c.bf16 %v234_v51, %v218_v50  ;;  %v217_v2 = vld [vmem:[%s4838_s17 + $0x1b0] sm:$0xff]  ;;  %v5062_v5 = vpack.c.bf16 %v260_v60, %v258_v59  ;;  %v257_v10 = vld [vmem:[%s4838_s17 + $0x1c0] sm:$0xff]  ;;  %v5080_v21 = vld [vmem:[%s4838_s17 + $0x2f8] sm:$0xf] }
  0x2a   : > { %4115 = vmatpush1.msk.msra.mxu1 %vm269_vm0, %v4977_v6  ;;  %4304 = vmatprep.subr.bf16.mxu0 %v4969_v1  ;;  %v233_v3 = vld [vmem:[%s4838_s17 + $0x250] sm:$0xff]  ;;  %v259_v11 = vld [vmem:[%s4838_s17 + $0x260] sm:$0xff]  ;;  %v172_v23 = vld [vmem:[%s4838_s17 + $0x8] sm:$0xff] }
  0x2b   : > { %4312 = vmatprep.subr.bf16.mxu1 %v4979_v7  ;;  %4113 = vmatmul.mubr.msk.f32.vlgmr.msra.gmra.mrb[2].mxu0 %vm265_vm1, %v4915_v43  ;;  %v5072_v16 = vpack.c.bf16 %v233_v3, %v217_v2  ;;  %v5076_v19 = vpack.c.bf16 %v259_v11, %v257_v10  ;;  %v188_v32 = vld [vmem:[%s4838_s17 + $0xa8] sm:$0xff]  ;;  %v171_v36 = vld [vmem:[%s4838_s17] sm:$0xff]  ;;  %v5096_v38 = vld [vmem:[%s4838_s17 + $0x2f0] sm:$0xf] }
  0x2c   : > { %4116 = vmatmul.mubr.msk.f32.vlgmr.msra.gmra.mrb[2].mxu1 %vm265_vm1, %v4915_v43  ;;  %4306 = vmatpush1.bf16.msra.mxu0 %v4983_v12  ;;  %v5086_v33 = vld [vmem:[%s4838_s17 + $0x308] sm:$0xf]  ;;  %v187_v37 = vld [vmem:[%s4838_s17 + $0xa0] sm:$0xff]  ;;  %v5098_v41 = vpack.c.bf16 %v188_v32, %v172_v23  ;;  %v5479_v32 = vld [vmem:[%s4838_s17 + $0x2f0] sm:$0xf] }
  0x2d   : > { %4314 = vmatpush1.bf16.msra.mxu1 %v4987_v14  ;;  %4308 = vmatprep.subr.bf16.mxu0 %v4989_v15  ;;  %v204_v42 = vld [vmem:[%s4838_s17 + $0x148] sm:$0xff]  ;;  %v5105_v50 = vld [vmem:[%s4838_s17 + $0x300] sm:$0xf]  ;;  %v5107_v51 = vpack.c.bf16 %v187_v37, %v171_v36  ;;  %v2670_v36 = vld [vmem:[%s4838_s17 + $0x278] sm:$0xff] }
  0x2e   : > { %4316 = vmatprep.subr.bf16.mxu1 %v4996_v20  ;;  %666 = vmatprep.mubr.f32.mxu0 %v4801_v0  ;;  %v220_v48 = vld [vmem:[%s4838_s17 + $0x1e8] sm:$0xff]  ;;  %v203_v60 = vld [vmem:[%s4838_s17 + $0x140] sm:$0xff] }
  0x2f   : > { %737 = vmatprep.mubr.f32.mxu1 %v4801_v0  ;;  %v5111_v59 = vpack.c.bf16 %v220_v48, %v204_v42  ;;  %v219_v2 = vld [vmem:[%s4838_s17 + $0x1e0] sm:$0xff]  ;;  %v5130_v10 = vld [vmem:[%s4838_s17 + $0x288] sm:$0xf]  ;;  %v2653_v42 = vld [vmem:[%s4838_s17 + $0x1d0] sm:$0xff] }
  0x30   : > { %4310 = vmatpush1.bf16.msra.mxu0 %v5006_v27  ;;  %v5124_v3 = vpack.c.bf16 %v219_v2, %v203_v60  ;;  %v251_v11 = vld [vmem:[%s5692_s1] sm:$0xff]  ;;  %v4153_v23 = vld [vmem:[%s5693_s2 + $0x8] sm:$0xff]  ;;  %v2669_v48 = vld [vmem:[%s4838_s17 + $0x270] sm:$0xff] }
  0x31   : > { %4318 = vmatpush1.bf16.msra.mxu1 %v5010_v29  ;;  %4117 = vmatprep.subr.msk.mxu0 %vm269_vm0, %v5013_v30  ;;  %v5520_v60 = vld [vmem:[%s4838_s17 + $0x300] sm:$0xf]  ;;  %v5525_v2 = vld [vmem:[%s4838_s17 + $0x310] sm:$0xf] }
  0x32   : > { %4120 = vmatprep.subr.msk.mxu1 %vm269_vm0, %v5017_v31 }
  0x34   : > { %4118 = vmatpush1.msk.msra.mxu0 %vm269_vm0, %v5023_v34 }
  0x35   : > { %4121 = vmatpush1.msk.msra.mxu1 %vm269_vm0, %v5043_v56  ;;  %4320 = vmatprep.subr.bf16.mxu0 %v5035_v47 }
  0x36   : > { %4328 = vmatprep.subr.bf16.mxu1 %v5045_v57  ;;  %4119 = vmatmul.mubr.msk.f32.vlgmr.msra.gmra.mrb[4].mxu0 %vm265_vm1, %v4915_v43 }
  0x37   : > { %4122 = vmatmul.mubr.msk.f32.vlgmr.msra.gmra.mrb[4].mxu1 %vm265_vm1, %v4915_v43  ;;  %4322 = vmatpush1.bf16.msra.mxu0 %v5049_v61 }
  0x38   : > { %4330 = vmatpush1.bf16.msra.mxu1 %v5053_v62  ;;  %4324 = vmatprep.subr.bf16.mxu0 %v5055_v63 }
  0x39   : > { %4332 = vmatprep.subr.bf16.mxu1 %v5062_v5  ;;  %808 = vmatprep.mubr.f32.mxu0 %v4801_v0 }
  0x3a   : > { %879 = vmatprep.mubr.f32.mxu1 %v4801_v0 }
  0x3b   : > { %4326 = vmatpush1.bf16.msra.mxu0 %v5072_v16 }
  0x3c   : > { %4334 = vmatpush1.bf16.msra.mxu1 %v5076_v19  ;;  %4123 = vmatprep.subr.msk.mxu0 %vm269_vm0, %v5080_v21 }
  0x3d   : > { %4126 = vmatprep.subr.msk.mxu1 %vm269_vm0, %v5086_v33 }
  0x3f   : > { %4124 = vmatpush1.msk.msra.mxu0 %vm269_vm0, %v5096_v38 }
  0x40   : > { %4127 = vmatpush1.msk.msra.mxu1 %vm269_vm0, %v5105_v50  ;;  %4336 = vmatprep.subr.bf16.mxu0 %v5098_v41 }
  0x41   : > { %4344 = vmatprep.subr.bf16.mxu1 %v4843_v4  ;;  %4125 = vmatmul.mubr.msk.f32.vlgmr.msra.gmra.mrb[6].mxu0 %vm265_vm1, %v4915_v43 }
  0x42   : > { %4128 = vmatmul.mubr.msk.f32.vlgmr.msra.gmra.mrb[6].mxu1 %vm265_vm1, %v4915_v43  ;;  %4338 = vmatpush1.bf16.msra.mxu0 %v5107_v51  ;;  %v5139_v43 = vld [vmem:[%s4838_s17 + $0x280] sm:$0xf] }
  0x43   : > { %4346 = vmatpush1.bf16.msra.mxu1 %v4850_v9  ;;  %4340 = vmatprep.subr.bf16.mxu0 %v5111_v59 }
  0x44   : > { %4348 = vmatprep.subr.bf16.mxu1 %v4863_v17  ;;  %959 = vmatprep.mubr.f32.mxu0 %v4801_v0 }
  0x45   : > { %1030 = vmatprep.mubr.f32.mxu1 %v4801_v0 }
  0x46   : > { %4342 = vmatpush1.bf16.msra.mxu0 %v5124_v3 }
  0x47   : > { %4350 = vmatpush1.bf16.msra.mxu1 %v4871_v22  ;;  %4129 = vmatprep.subr.msk.mxu0 %vm269_vm0, %v5130_v10 }
  0x48   : > { %4132 = vmatprep.subr.msk.mxu1 %vm269_vm0, %v4879_v25 }
  0x4a   : > { %4130 = vmatpush1.msk.msra.mxu0 %vm269_vm0, %v5139_v43 }
  0x4b   : > { %4133 = vmatpush1.msk.msra.mxu1 %vm269_vm0, %v4886_v28  ;;  %4352 = vmatprep.subr.bf16.mxu0 %v4848_v8 }
  0x4c   : > { %4360 = vmatprep.subr.bf16.mxu1 %v4898_v35  ;;  %4131 = vmatmul.mubr.msk.f32.vlgmr.msra.gmra.mrb[0].mxu0 %vm265_vm1, %v251_v11 }
  0x4d   : > { %4134 = vmatmul.mubr.msk.f32.vlgmr.msra.gmra.mrb[0].mxu1 %vm265_vm1, %v251_v11  ;;  %4354 = vmatpush1.bf16.msra.mxu0 %v4856_v13 }
  0x4e   : > { %4362 = vmatpush1.bf16.msra.mxu1 %v4917_v44  ;;  %4356 = vmatprep.subr.bf16.mxu0 %v4865_v18 }
  0x4f   : > { %4364 = vmatprep.subr.bf16.mxu1 %v4923_v46  ;;  %1101 = vmatprep.mubr.f32.mxu0 %v4801_v0 }
  0x50   : > { %1172 = vmatprep.mubr.f32.mxu1 %v4801_v0 }
  0x51   : > { %4358 = vmatpush1.bf16.msra.mxu0 %v4876_v24 }
  0x52   : > { %4366 = vmatpush1.bf16.msra.mxu1 %v4940_v52  ;;  %4135 = vmatprep.subr.msk.mxu0 %vm269_vm0, %v4882_v26 }
  0x53   : > { %4138 = vmatprep.subr.msk.mxu1 %vm269_vm0, %v4947_v54 }
  0x55   : > { %4136 = vmatpush1.msk.msra.mxu0 %vm269_vm0, %v4906_v39 }
  0x56   : > { %4139 = vmatpush1.msk.msra.mxu1 %vm269_vm0, %v4957_v58  ;;  %4368 = vmatprep.subr.bf16.mxu0 %v4908_v40 }
  0x57   : > { %4376 = vmatprep.subr.bf16.mxu1 %v4969_v1  ;;  %4137 = vmatmul.mubr.msk.f32.vlgmr.msra.gmra.mrb[2].mxu0 %vm265_vm1, %v251_v11 }
  0x58   : > { %4140 = vmatmul.mubr.msk.f32.vlgmr.msra.gmra.mrb[2].mxu1 %vm265_vm1, %v251_v11  ;;  %4370 = vmatpush1.bf16.msra.mxu0 %v4921_v45 }
  0x59   : > { %4378 = vmatpush1.bf16.msra.mxu1 %v4983_v12  ;;  %4372 = vmatprep.subr.bf16.mxu0 %v4930_v49 }
  0x5a   : > { %4380 = vmatprep.subr.bf16.mxu1 %v4989_v15  ;;  %1243 = vmatprep.mubr.f32.mxu0 %v4801_v0 }
  0x5b   : > { %1314 = vmatprep.mubr.f32.mxu1 %v4801_v0 }
  0x5c   : > { %4374 = vmatpush1.bf16.msra.mxu0 %v4944_v53 }
  0x5d   : > { %4382 = vmatpush1.bf16.msra.mxu1 %v5006_v27  ;;  %4141 = vmatprep.subr.msk.mxu0 %vm269_vm0, %v4951_v55 }
  0x5e   : > { %4144 = vmatprep.subr.msk.mxu1 %vm269_vm0, %v5013_v30 }
  0x60   : > { %4142 = vmatpush1.msk.msra.mxu0 %vm269_vm0, %v4977_v6 }
  0x61   : > { %4145 = vmatpush1.msk.msra.mxu1 %vm269_vm0, %v5023_v34  ;;  %4384 = vmatprep.subr.bf16.mxu0 %v4979_v7 }
  0x62   : > { %4392 = vmatprep.subr.bf16.mxu1 %v5035_v47  ;;  %4143 = vmatmul.mubr.msk.f32.vlgmr.msra.gmra.mrb[4].mxu0 %vm265_vm1, %v251_v11 }
  0x63   : > { %4146 = vmatmul.mubr.msk.f32.vlgmr.msra.gmra.mrb[4].mxu1 %vm265_vm1, %v251_v11  ;;  %4386 = vmatpush1.bf16.msra.mxu0 %v4987_v14 }
  0x64   : > { %4394 = vmatpush1.bf16.msra.mxu1 %v5049_v61  ;;  %4388 = vmatprep.subr.bf16.mxu0 %v4996_v20 }
  0x65   : > { %4396 = vmatprep.subr.bf16.mxu1 %v5055_v63  ;;  %1385 = vmatprep.mubr.f32.mxu0 %v4801_v0 }
  0x66   : > { %1456 = vmatprep.mubr.f32.mxu1 %v4801_v0 }
  0x67   : > { %4390 = vmatpush1.bf16.msra.mxu0 %v5010_v29 }
  0x68   : > { %4398 = vmatpush1.bf16.msra.mxu1 %v5072_v16  ;;  %4147 = vmatprep.subr.msk.mxu0 %vm269_vm0, %v5017_v31 }
  0x69   : > { %4150 = vmatprep.subr.msk.mxu1 %vm269_vm0, %v5080_v21 }
  0x6b   : > { %4148 = vmatpush1.msk.msra.mxu0 %vm269_vm0, %v5043_v56 }
  0x6c   : > { %4151 = vmatpush1.msk.msra.mxu1 %vm269_vm0, %v5096_v38  ;;  %4400 = vmatprep.subr.bf16.mxu0 %v4843_v4 }
  0x6d   : > { %4408 = vmatprep.subr.bf16.mxu1 %v4848_v8  ;;  %4149 = vmatmul.mubr.msk.f32.vlgmr.msra.gmra.mrb[6].mxu0 %vm265_vm1, %v251_v11 }
  0x6e   : > { %4152 = vmatmul.mubr.msk.f32.vlgmr.msra.gmra.mrb[6].mxu1 %vm265_vm1, %v251_v11  ;;  %4402 = vmatpush1.bf16.msra.mxu0 %v4850_v9 }
  0x6f   : > { %4410 = vmatpush1.bf16.msra.mxu1 %v4856_v13  ;;  %4404 = vmatprep.subr.bf16.mxu0 %v4863_v17 }
  0x70   : > { %4412 = vmatprep.subr.bf16.mxu1 %v4865_v18  ;;  %1532 = vmatprep.mubr.f32.mxu0 %v4801_v0 }
  0x71   : > { %1603 = vmatprep.mubr.f32.mxu1 %v4801_v0 }
  0x72   : > { %4406 = vmatpush1.bf16.msra.mxu0 %v4871_v22 }
  0x73   : > { %4414 = vmatpush1.bf16.msra.mxu1 %v4876_v24  ;;  %4154 = vmatprep.subr.msk.mxu0 %vm269_vm0, %v4879_v25 }
  0x74   : > { %4157 = vmatprep.subr.msk.mxu1 %vm269_vm0, %v4882_v26 }
  0x76   : > { %4155 = vmatpush1.msk.msra.mxu0 %vm269_vm0, %v4886_v28 }
  0x77   : > { %4158 = vmatpush1.msk.msra.mxu1 %vm269_vm0, %v4906_v39  ;;  %4416 = vmatprep.subr.bf16.mxu0 %v4898_v35 }
  0x78   : > { %4424 = vmatprep.subr.bf16.mxu1 %v4908_v40  ;;  %4156 = vmatmul.mubr.msk.f32.vlgmr.msra.gmra.mrb[8].mxu0 %vm265_vm1, %v4153_v23 }
  0x79   : > { %4159 = vmatmul.mubr.msk.f32.vlgmr.msra.gmra.mrb[8].mxu1 %vm265_vm1, %v4153_v23  ;;  %4418 = vmatpush1.bf16.msra.mxu0 %v4917_v44 }
  0x7a   : > { %4426 = vmatpush1.bf16.msra.mxu1 %v4921_v45  ;;  %4420 = vmatprep.subr.bf16.mxu0 %v4923_v46 }
  0x7b   : > { %4428 = vmatprep.subr.bf16.mxu1 %v4930_v49  ;;  %1674 = vmatprep.mubr.f32.mxu0 %v4801_v0 }
  0x7c   : > { %1745 = vmatprep.mubr.f32.mxu1 %v4801_v0 }
  0x7d   : > { %4422 = vmatpush1.bf16.msra.mxu0 %v4940_v52 }
  0x7e   : > { %4430 = vmatpush1.bf16.msra.mxu1 %v4944_v53  ;;  %4160 = vmatprep.subr.msk.mxu0 %vm269_vm0, %v4947_v54 }
  0x7f   : > { %4163 = vmatprep.subr.msk.mxu1 %vm269_vm0, %v4951_v55 }
  0x81   : > { %4161 = vmatpush1.msk.msra.mxu0 %vm269_vm0, %v4957_v58 }
  0x82   : > { %4164 = vmatpush1.msk.msra.mxu1 %vm269_vm0, %v4977_v6  ;;  %4432 = vmatprep.subr.bf16.mxu0 %v4969_v1 }
  0x83   : > { %4440 = vmatprep.subr.bf16.mxu1 %v4979_v7  ;;  %4162 = vmatmul.mubr.msk.f32.vlgmr.msra.gmra.mrb[10].mxu0 %vm265_vm1, %v4153_v23 }
  0x84   : > { %4165 = vmatmul.mubr.msk.f32.vlgmr.msra.gmra.mrb[10].mxu1 %vm265_vm1, %v4153_v23  ;;  %4434 = vmatpush1.bf16.msra.mxu0 %v4983_v12 }
  0x85   : > { %4442 = vmatpush1.bf16.msra.mxu1 %v4987_v14  ;;  %4436 = vmatprep.subr.bf16.mxu0 %v4989_v15 }
  0x86   : > { %4444 = vmatprep.subr.bf16.mxu1 %v4996_v20  ;;  %1816 = vmatprep.mubr.f32.mxu0 %v4801_v0 }
  0x87   : > { %1887 = vmatprep.mubr.f32.mxu1 %v4801_v0 }
  0x88   : > { %4438 = vmatpush1.bf16.msra.mxu0 %v5006_v27 }
  0x89   : > { %4446 = vmatpush1.bf16.msra.mxu1 %v5010_v29  ;;  %4166 = vmatprep.subr.msk.mxu0 %vm269_vm0, %v5013_v30 }
  0x8a   : > { %4169 = vmatprep.subr.msk.mxu1 %vm269_vm0, %v5017_v31 }
  0x8c   : > { %4167 = vmatpush1.msk.msra.mxu0 %vm269_vm0, %v5023_v34 }
  0x8d   : > { %4170 = vmatpush1.msk.msra.mxu1 %vm269_vm0, %v5043_v56  ;;  %4448 = vmatprep.subr.bf16.mxu0 %v5035_v47 }
  0x8e   : > { %4456 = vmatprep.subr.bf16.mxu1 %v5045_v57  ;;  %4168 = vmatmul.mubr.msk.f32.vlgmr.msra.gmra.mrb[12].mxu0 %vm265_vm1, %v4153_v23 }
  0x8f   : > { %4171 = vmatmul.mubr.msk.f32.vlgmr.msra.gmra.mrb[12].mxu1 %vm265_vm1, %v4153_v23  ;;  %4450 = vmatpush1.bf16.msra.mxu0 %v5049_v61 }
  0x90   : > { %4458 = vmatpush1.bf16.msra.mxu1 %v5053_v62  ;;  %4452 = vmatprep.subr.bf16.mxu0 %v5055_v63 }
  0x91   : > { %4460 = vmatprep.subr.bf16.mxu1 %v5062_v5  ;;  %1958 = vmatprep.mubr.f32.mxu0 %v4801_v0 }
  0x92   : > { %2029 = vmatprep.mubr.f32.mxu1 %v4801_v0 }
  0x93   : > { %4454 = vmatpush1.bf16.msra.mxu0 %v5072_v16 }
  0x94   : > { %4462 = vmatpush1.bf16.msra.mxu1 %v5076_v19  ;;  %4172 = vmatprep.subr.msk.mxu0 %vm269_vm0, %v5080_v21 }
  0x95   : > { %4175 = vmatprep.subr.msk.mxu1 %vm269_vm0, %v5086_v33  ;;  %v2654_v33 = vld [vmem:[%s4838_s17 + $0x1d8] sm:$0xff] }
  0x97   : > { %4173 = vmatpush1.msk.msra.mxu0 %vm269_vm0, %v5096_v38 }
  0x98   : > { %4176 = vmatpush1.msk.msra.mxu1 %vm269_vm0, %v5105_v50  ;;  %4464 = vmatprep.subr.bf16.mxu0 %v5098_v41  ;;  %v5493_v41 = vpack.c.bf16 %v2670_v36, %v2654_v33  ;;  %v5504_v50 = vpack.c.bf16 %v2669_v48, %v2653_v42 }
  0x99   : > { %4472 = vmatprep.subr.bf16.mxu1 %v4843_v4  ;;  %4174 = vmatmul.mubr.msk.f32.vlgmr.msra.gmra.mrb[14].mxu0 %vm265_vm1, %v4153_v23  ;;  %v252_v4 = vld [vmem:[%s5693_s2] sm:$0xff] }
  0x9a   : > { %4177 = vmatmul.mubr.msk.f32.vlgmr.msra.gmra.mrb[14].mxu1 %vm265_vm1, %v4153_v23  ;;  %4466 = vmatpush1.bf16.msra.mxu0 %v5107_v51  ;;  %v5508_v51 = vld [vmem:[%s4838_s17 + $0x308] sm:$0xf] }
  0x9b   : > { %4474 = vmatpush1.bf16.msra.mxu1 %v4850_v9  ;;  %4468 = vmatprep.subr.bf16.mxu0 %v5111_v59  ;;  %v5385_v9 = vld [vmem:[%s4838_s17 + $0x2a8] sm:$0xf]  ;;  %v5512_v59 = vld [vmem:[%s4838_s17 + $0x318] sm:$0xf] }
  0x9c   : > { %4476 = vmatprep.subr.bf16.mxu1 %v4863_v17  ;;  %2103 = vmatprep.mubr.f32.mxu0 %v4801_v0  ;;  %v5389_v17 = vld [vmem:[%s4838_s17 + $0x2b8] sm:$0xf] }
  0x9d   : > { %2174 = vmatprep.mubr.f32.mxu1 %v4801_v0 }
  0x9e   : > { %4470 = vmatpush1.bf16.msra.mxu0 %v5124_v3 }
  0x9f   : > { %4478 = vmatpush1.bf16.msra.mxu1 %v4871_v22  ;;  %4178 = vmatprep.subr.msk.mxu0 %vm269_vm0, %v5130_v10  ;;  %v5397_v22 = vld [vmem:[%s4838_s17 + $0x2a0] sm:$0xf] }
  0xa0   : > { %4181 = vmatprep.subr.msk.mxu1 %vm269_vm0, %v4879_v25  ;;  %v5402_v25 = vld [vmem:[%s4838_s17 + $0x2b0] sm:$0xf] }
  0xa2   : > { %4179 = vmatpush1.msk.msra.mxu0 %vm269_vm0, %v5139_v43 }
  0xa3   : > { %4182 = vmatpush1.msk.msra.mxu1 %vm269_vm0, %v4886_v28  ;;  %4480 = vmatprep.subr.bf16.mxu0 %v4848_v8  ;;  %v5424_v28 = vld [vmem:[%s4838_s17 + $0x2c8] sm:$0xf] }
  0xa4   : > { %4488 = vmatprep.subr.bf16.mxu1 %v4898_v35  ;;  %4180 = vmatmul.mubr.msk.f32.vlgmr.msra.gmra.mrb[8].mxu0 %vm265_vm1, %v252_v4 }
  0xa5   : > { %4183 = vmatmul.mubr.msk.f32.vlgmr.msra.gmra.mrb[8].mxu1 %vm265_vm1, %v252_v4  ;;  %4482 = vmatpush1.bf16.msra.mxu0 %v4856_v13 }
  0xa6   : > { %4490 = vmatpush1.bf16.msra.mxu1 %v4917_v44  ;;  %4484 = vmatprep.subr.bf16.mxu0 %v4865_v18 }
  0xa7   : > { %4492 = vmatprep.subr.bf16.mxu1 %v4923_v46  ;;  %2245 = vmatprep.mubr.f32.mxu0 %v4801_v0 }
  0xa8   : > { %2316 = vmatprep.mubr.f32.mxu1 %v4801_v0 }
  0xa9   : > { %4486 = vmatpush1.bf16.msra.mxu0 %v4876_v24 }
  0xaa   : > { %4494 = vmatpush1.bf16.msra.mxu1 %v4940_v52  ;;  %4184 = vmatprep.subr.msk.mxu0 %vm269_vm0, %v4882_v26  ;;  %v5407_v26 = vld [vmem:[%s5692_s1 + $0x10] sm:$0xff] }
  0xab   : > { %4187 = vmatprep.subr.msk.mxu1 %vm269_vm0, %v4947_v54  ;;  %v5436_v54 = vld [vmem:[%s4838_s17 + $0x2c0] sm:$0xf] }
  0xad   : > { %4185 = vmatpush1.msk.msra.mxu0 %vm269_vm0, %v4906_v39  ;;  %v5428_v39 = vld [vmem:[%s4838_s17 + $0x2d8] sm:$0xf] }
  0xae   : > { %4188 = vmatpush1.msk.msra.mxu1 %vm269_vm0, %v4957_v58  ;;  %4496 = vmatprep.subr.bf16.mxu0 %v4908_v40  ;;  %v5458_v58 = vld [vmem:[%s4838_s17 + $0x2e8] sm:$0xf] }
  0xaf   : > { %4504 = vmatprep.subr.bf16.mxu1 %v4969_v1  ;;  %4186 = vmatmul.mubr.msk.f32.vlgmr.msra.gmra.mrb[10].mxu0 %vm265_vm1, %v252_v4 }
  0xb0   : > { %4189 = vmatmul.mubr.msk.f32.vlgmr.msra.gmra.mrb[10].mxu1 %vm265_vm1, %v252_v4  ;;  %4498 = vmatpush1.bf16.msra.mxu0 %v4921_v45 }
  0xb1   : > { %4506 = vmatpush1.bf16.msra.mxu1 %v4983_v12  ;;  %4500 = vmatprep.subr.bf16.mxu0 %v4930_v49 }
  0xb2   : > { %4508 = vmatprep.subr.bf16.mxu1 %v4989_v15  ;;  %2387 = vmatprep.mubr.f32.mxu0 %v4801_v0 }
  0xb3   : > { %2458 = vmatprep.mubr.f32.mxu1 %v4801_v0 }
  0xb4   : > { %4502 = vmatpush1.bf16.msra.mxu0 %v4944_v53 }
  0xb5   : > { %4510 = vmatpush1.bf16.msra.mxu1 %v5006_v27  ;;  %4190 = vmatprep.subr.msk.mxu0 %vm269_vm0, %v4951_v55  ;;  %v5441_v55 = vld [vmem:[%s4838_s17 + $0x2d0] sm:$0xf] }
  0xb6   : > { %4193 = vmatprep.subr.msk.mxu1 %vm269_vm0, %v5013_v30  ;;  %v2622_v30 = vld [vmem:[%s4838_s17 + $0x98] sm:$0xff] }
  0xb8   : > { %4191 = vmatpush1.msk.msra.mxu0 %vm269_vm0, %v4977_v6  ;;  %v5462_v6 = vld [vmem:[%s4838_s17 + $0x2f8] sm:$0xf] }
  0xb9   : > { %4194 = vmatpush1.msk.msra.mxu1 %vm269_vm0, %v5023_v34  ;;  %4512 = vmatprep.subr.bf16.mxu0 %v4979_v7  ;;  %v5472_v34 = vld [vmem:[%s4838_s17 + $0x2e0] sm:$0xf] }
  0xba   : > { %4520 = vmatprep.subr.bf16.mxu1 %v5035_v47  ;;  %4192 = vmatmul.mubr.msk.f32.vlgmr.msra.gmra.mrb[12].mxu0 %vm265_vm1, %v252_v4 }
  0xbb   : > { %4195 = vmatmul.mubr.msk.f32.vlgmr.msra.gmra.mrb[12].mxu1 %vm265_vm1, %v252_v4  ;;  %4514 = vmatpush1.bf16.msra.mxu0 %v4987_v14 }
  0xbc   : > { %4522 = vmatpush1.bf16.msra.mxu1 %v5049_v61  ;;  %4516 = vmatprep.subr.bf16.mxu0 %v4996_v20 }
  0xbd   : > { %4524 = vmatprep.subr.bf16.mxu1 %v5055_v63  ;;  %2529 = vmatprep.mubr.f32.mxu0 %v4801_v0 }
  0xbe   : > { %2600 = vmatprep.mubr.f32.mxu1 %v4801_v0 }
  0xbf   : > { %4518 = vmatpush1.bf16.msra.mxu0 %v5010_v29 }
  0xc0   : > { %4526 = vmatpush1.bf16.msra.mxu1 %v5072_v16  ;;  %4196 = vmatprep.subr.msk.mxu0 %vm269_vm0, %v5017_v31  ;;  %v2638_v31 = vld [vmem:[%s4838_s17 + $0x138] sm:$0xff] }
  0xc1   : > { %4199 = vmatprep.subr.msk.mxu1 %vm269_vm0, %v5080_v21  ;;  %v2637_v21 = vld [vmem:[%s4838_s17 + $0x130] sm:$0xff]  ;;  %v5483_v37 = vpack.c.bf16 %v2638_v31, %v2622_v30 }
  0xc3   : > { %4197 = vmatpush1.msk.msra.mxu0 %vm269_vm0, %v5043_v56  ;;  %v2621_v56 = vld [vmem:[%s4838_s17 + $0x90] sm:$0xff] }
  0xc4   : > { %4200 = vmatpush1.msk.msra.mxu1 %vm269_vm0, %v5096_v38  ;;  %4528 = vmatprep.subr.bf16.mxu0 %v4848_v8  ;;  %v5487_v38 = vpack.c.bf16 %v2637_v21, %v2621_v56 }
  0xc5   : > { %4536 = vmatprep.subr.bf16.mxu1 %v4898_v35  ;;  %4198 = vmatmul.mubr.msk.f32.vlgmr.msra.gmra.mrb[14].mxu0 %vm265_vm1, %v252_v4 }
  0xc6   : > { %4201 = vmatmul.mubr.msk.f32.vlgmr.msra.gmra.mrb[14].mxu1 %vm265_vm1, %v252_v4  ;;  %4530 = vmatpush1.bf16.msra.mxu0 %v4856_v13 }
  0xc7   : > { %4538 = vmatpush1.bf16.msra.mxu1 %v4917_v44  ;;  %4532 = vmatprep.subr.bf16.mxu0 %v4865_v18 }
  0xc8   : > { %4540 = vmatprep.subr.bf16.mxu1 %v4923_v46  ;;  %2804 = vmatprep.mubr.f32.mxu0 %v4801_v0 }
  0xc9   : > { %2875 = vmatprep.mubr.f32.mxu1 %v4801_v0 }
  0xca   : > { %4534 = vmatpush1.bf16.msra.mxu0 %v4876_v24 }
  0xcb   : > { %4542 = vmatpush1.bf16.msra.mxu1 %v4940_v52  ;;  %4203 = vmatprep.subr.msk.mxu0 %vm269_vm0, %v5385_v9 }
  0xcc   : > { %4206 = vmatprep.subr.msk.mxu1 %vm269_vm0, %v5389_v17 }
  0xce   : > { %4204 = vmatpush1.msk.msra.mxu0 %vm269_vm0, %v5397_v22 }
  0xcf   : > { %4207 = vmatpush1.msk.msra.mxu1 %vm269_vm0, %v5402_v25  ;;  %4205 = vmatmul.mubr.msk.f32.vlgmr.msra.gmra.mrb[0].mxu0 %vm265_vm1, %v5407_v26 }
  0xd0   : > { %4208 = vmatmul.mubr.msk.f32.vlgmr.msra.gmra.mrb[0].mxu1 %vm265_vm1, %v5407_v26  ;;  %4544 = vmatprep.subr.bf16.mxu0 %v4908_v40 }
  0xd1   : > { %4552 = vmatprep.subr.bf16.mxu1 %v4969_v1  ;;  %4546 = vmatpush1.bf16.msra.mxu0 %v4921_v45 }
  0xd2   : > { %4554 = vmatpush1.bf16.msra.mxu1 %v4983_v12  ;;  %4548 = vmatprep.subr.bf16.mxu0 %v4930_v49 }
  0xd3   : > { %4556 = vmatprep.subr.bf16.mxu1 %v4989_v15  ;;  %2946 = vmatprep.mubr.f32.mxu0 %v4801_v0 }
  0xd4   : > { %3017 = vmatprep.mubr.f32.mxu1 %v4801_v0 }
  0xd5   : > { %4550 = vmatpush1.bf16.msra.mxu0 %v4944_v53 }
  0xd6   : > { %4558 = vmatpush1.bf16.msra.mxu1 %v5006_v27  ;;  %4209 = vmatprep.subr.msk.mxu0 %vm269_vm0, %v5424_v28 }
  0xd7   : > { %4212 = vmatprep.subr.msk.mxu1 %vm269_vm0, %v5428_v39 }
  0xd9   : > { %4210 = vmatpush1.msk.msra.mxu0 %vm269_vm0, %v5436_v54 }
  0xda   : > { %4213 = vmatpush1.msk.msra.mxu1 %vm269_vm0, %v5441_v55  ;;  %4211 = vmatmul.mubr.msk.f32.vlgmr.msra.gmra.mrb[2].mxu0 %vm265_vm1, %v5407_v26 }
  0xdb   : > { %4214 = vmatmul.mubr.msk.f32.vlgmr.msra.gmra.mrb[2].mxu1 %vm265_vm1, %v5407_v26  ;;  %4560 = vmatprep.subr.bf16.mxu0 %v4979_v7 }
  0xdc   : > { %4568 = vmatprep.subr.bf16.mxu1 %v5035_v47  ;;  %4562 = vmatpush1.bf16.msra.mxu0 %v4987_v14 }
  0xdd   : > { %4570 = vmatpush1.bf16.msra.mxu1 %v5049_v61  ;;  %4564 = vmatprep.subr.bf16.mxu0 %v4996_v20 }
  0xde   : > { %4572 = vmatprep.subr.bf16.mxu1 %v5055_v63  ;;  %3088 = vmatprep.mubr.f32.mxu0 %v4801_v0 }
  0xdf   : > { %3159 = vmatprep.mubr.f32.mxu1 %v4801_v0 }
  0xe0   : > { %4566 = vmatpush1.bf16.msra.mxu0 %v5010_v29 }
  0xe1   : > { %4574 = vmatpush1.bf16.msra.mxu1 %v5072_v16  ;;  %4215 = vmatprep.subr.msk.mxu0 %vm269_vm0, %v5458_v58 }
  0xe2   : > { %4218 = vmatprep.subr.msk.mxu1 %vm269_vm0, %v5462_v6 }
  0xe4   : > { %4216 = vmatpush1.msk.msra.mxu0 %vm269_vm0, %v5472_v34 }
  0xe5   : > { %4219 = vmatpush1.msk.msra.mxu1 %vm269_vm0, %v5479_v32  ;;  %4217 = vmatmul.mubr.msk.f32.vlgmr.msra.gmra.mrb[4].mxu0 %vm265_vm1, %v5407_v26 }
  0xe6   : > { %4220 = vmatmul.mubr.msk.f32.vlgmr.msra.gmra.mrb[4].mxu1 %vm265_vm1, %v5407_v26  ;;  %4576 = vmatprep.subr.bf16.mxu0 %v5045_v57 }
  0xe7   : > { %4584 = vmatprep.subr.bf16.mxu1 %v5483_v37  ;;  %4578 = vmatpush1.bf16.msra.mxu0 %v5053_v62 }
  0xe8   : > { %4586 = vmatpush1.bf16.msra.mxu1 %v5487_v38  ;;  %4580 = vmatprep.subr.bf16.mxu0 %v5062_v5 }
  0xe9   : > { %4588 = vmatprep.subr.bf16.mxu1 %v5493_v41  ;;  %3230 = vmatprep.mubr.f32.mxu0 %v4801_v0 }
  0xea   : > { %3301 = vmatprep.mubr.f32.mxu1 %v4801_v0 }
  0xeb   : > { %4582 = vmatpush1.bf16.msra.mxu0 %v5076_v19 }
  0xec   : > { %4590 = vmatpush1.bf16.msra.mxu1 %v5504_v50  ;;  %4221 = vmatprep.subr.msk.mxu0 %vm269_vm0, %v5508_v51 }
  0xed   : > { %4224 = vmatprep.subr.msk.mxu1 %vm269_vm0, %v5512_v59 }
  0xef   : > { %4222 = vmatpush1.msk.msra.mxu0 %vm269_vm0, %v5520_v60 }
  0xf0   : > { %4225 = vmatpush1.msk.msra.mxu1 %vm269_vm0, %v5525_v2  ;;  %4223 = vmatmul.mubr.msk.f32.vlgmr.msra.gmra.mrb[6].mxu0 %vm265_vm1, %v5407_v26 }
  0xf1   : > { %4226 = vmatmul.mubr.msk.f32.vlgmr.msra.gmra.mrb[6].mxu1 %vm265_vm1, %v5407_v26  ;;  %4592 = vmatprep.subr.bf16.mxu0 %v4848_v8  ;;  %v4227_v8 = vld [vmem:[%s5693_s2 + $0x10] sm:$0xff] }
  0xf2   : > { %4600 = vmatprep.subr.bf16.mxu1 %v4898_v35  ;;  %4594 = vmatpush1.bf16.msra.mxu0 %v4856_v13 }
  0xf3   : > { %4602 = vmatpush1.bf16.msra.mxu1 %v4917_v44  ;;  %4596 = vmatprep.subr.bf16.mxu0 %v4865_v18 }
  0xf4   : > { %4604 = vmatprep.subr.bf16.mxu1 %v4923_v46  ;;  %3393 = vmatprep.mubr.f32.mxu0 %v4801_v0 }
  0xf5   : > { %3464 = vmatprep.mubr.f32.mxu1 %v4801_v0 }
  0xf6   : > { %4598 = vmatpush1.bf16.msra.mxu0 %v4876_v24 }
  0xf7   : > { %4606 = vmatpush1.bf16.msra.mxu1 %v4940_v52  ;;  %4228 = vmatprep.subr.msk.mxu0 %vm269_vm0, %v5385_v9 }
  0xf8   : > { %4231 = vmatprep.subr.msk.mxu1 %vm269_vm0, %v5389_v17 }
  0xfa   : > { %4229 = vmatpush1.msk.msra.mxu0 %vm269_vm0, %v5397_v22 }
  0xfb   : > { %4232 = vmatpush1.msk.msra.mxu1 %vm269_vm0, %v5402_v25  ;;  %4230 = vmatmul.mubr.msk.f32.vlgmr.msra.gmra.mrb[8].mxu0 %vm265_vm1, %v4227_v8 }
  0xfc   : > { %4233 = vmatmul.mubr.msk.f32.vlgmr.msra.gmra.mrb[8].mxu1 %vm265_vm1, %v4227_v8  ;;  %4608 = vmatprep.subr.bf16.mxu0 %v4908_v40 }
  0xfd   : > { %4616 = vmatprep.subr.bf16.mxu1 %v4969_v1  ;;  %4610 = vmatpush1.bf16.msra.mxu0 %v4921_v45 }
  0xfe   : > { %4618 = vmatpush1.bf16.msra.mxu1 %v4983_v12  ;;  %4612 = vmatprep.subr.bf16.mxu0 %v4930_v49 }
  0xff   : > { %4620 = vmatprep.subr.bf16.mxu1 %v4989_v15  ;;  %3535 = vmatprep.mubr.f32.mxu0 %v4801_v0 }
 0x100   : > { %3606 = vmatprep.mubr.f32.mxu1 %v4801_v0 }
 0x101   : > { %4614 = vmatpush1.bf16.msra.mxu0 %v4944_v53 }
 0x102   : > { %4622 = vmatpush1.bf16.msra.mxu1 %v5006_v27  ;;  %4234 = vmatprep.subr.msk.mxu0 %vm269_vm0, %v5424_v28 }
 0x103   : > { %4237 = vmatprep.subr.msk.mxu1 %vm269_vm0, %v5428_v39 }
 0x105   : > { %4235 = vmatpush1.msk.msra.mxu0 %vm269_vm0, %v5436_v54 }
 0x106   : > { %4238 = vmatpush1.msk.msra.mxu1 %vm269_vm0, %v5441_v55  ;;  %4236 = vmatmul.mubr.msk.f32.vlgmr.msra.gmra.mrb[10].mxu0 %vm265_vm1, %v4227_v8 }
 0x107   : > { %4239 = vmatmul.mubr.msk.f32.vlgmr.msra.gmra.mrb[10].mxu1 %vm265_vm1, %v4227_v8  ;;  %4624 = vmatprep.subr.bf16.mxu0 %v4979_v7 }
 0x108   : > { %4632 = vmatprep.subr.bf16.mxu1 %v5035_v47  ;;  %4626 = vmatpush1.bf16.msra.mxu0 %v4987_v14 }
 0x109   : > { %4634 = vmatpush1.bf16.msra.mxu1 %v5049_v61  ;;  %4628 = vmatprep.subr.bf16.mxu0 %v4996_v20 }
 0x10a   : > { %4636 = vmatprep.subr.bf16.mxu1 %v5055_v63  ;;  %3677 = vmatprep.mubr.f32.mxu0 %v4801_v0 }
 0x10b   : > { %3748 = vmatprep.mubr.f32.mxu1 %v4801_v0 }
 0x10c   : > { %4630 = vmatpush1.bf16.msra.mxu0 %v5010_v29 }
 0x10d   : > { %4638 = vmatpush1.bf16.msra.mxu1 %v5072_v16  ;;  %4240 = vmatprep.subr.msk.mxu0 %vm269_vm0, %v5458_v58 }
 0x10e   : > { %4243 = vmatprep.subr.msk.mxu1 %vm269_vm0, %v5462_v6 }
 0x110   : > { %4241 = vmatpush1.msk.msra.mxu0 %vm269_vm0, %v5472_v34 }
 0x111   : > { %4244 = vmatpush1.msk.msra.mxu1 %vm269_vm0, %v5479_v32  ;;  %4242 = vmatmul.mubr.msk.f32.vlgmr.msra.gmra.mrb[12].mxu0 %vm265_vm1, %v4227_v8 }
 0x112   : > { %4245 = vmatmul.mubr.msk.f32.vlgmr.msra.gmra.mrb[12].mxu1 %vm265_vm1, %v4227_v8  ;;  %4640 = vmatprep.subr.bf16.mxu0 %v5045_v57 }
 0x113   : > { %4648 = vmatprep.subr.bf16.mxu1 %v5483_v37  ;;  %4642 = vmatpush1.bf16.msra.mxu0 %v5053_v62 }
 0x114   : > { %4650 = vmatpush1.bf16.msra.mxu1 %v5487_v38  ;;  %4644 = vmatprep.subr.bf16.mxu0 %v5062_v5 }
 0x115   : > { %4652 = vmatprep.subr.bf16.mxu1 %v5493_v41  ;;  %3819 = vmatprep.mubr.f32.mxu0 %v4801_v0 }
 0x116   : > { %3890 = vmatprep.mubr.f32.mxu1 %v4801_v0 }
 0x117   : > { %4646 = vmatpush1.bf16.msra.mxu0 %v5076_v19 }
 0x118   : > { %4654 = vmatpush1.bf16.msra.mxu1 %v5504_v50  ;;  %4246 = vmatprep.subr.msk.mxu0 %vm269_vm0, %v5508_v51 }
 0x119   : > { %4249 = vmatprep.subr.msk.mxu1 %vm269_vm0, %v5512_v59 }
 0x11b   : > { %4247 = vmatpush1.msk.msra.mxu0 %vm269_vm0, %v5520_v60 }
 0x11c   : > { %4250 = vmatpush1.msk.msra.mxu1 %vm269_vm0, %v5525_v2  ;;  %4248 = vmatmul.mubr.msk.f32.vlgmr.msra.gmra.mrb[14].mxu0 %vm265_vm1, %v4227_v8 }
 0x11d   : > { %4251 = vmatmul.mubr.msk.f32.vlgmr.msra.gmra.mrb[14].mxu1 %vm265_vm1, %v4227_v8 }
 0x1a2   : > { %v5618_v0 = vpop.f32.mrb[0].mxu0 }
 0x1a3   : > { %v5620_v13 = vpop.f32.mrb[0].mxu1  ;;  %v5622_v18 = vpop.f32.mrb[1].mxu0 }
 0x1a4   : > { %v5624_v24 = vpop.f32.mrb[1].mxu1 }
 0x1ad   : > { %v5626_v35 = vpop.f32.mrb[2].mxu0 }
 0x1ae   : > { %v5628_v40 = vpop.f32.mrb[2].mxu1  ;;  %v5630_v44 = vpop.f32.mrb[3].mxu0 }
 0x1af   : > { %v5632_v45 = vpop.f32.mrb[3].mxu1 }
 0x1b8   : > { %v5634_v46 = vpop.f32.mrb[4].mxu0 }
 0x1b9   : > { %v5636_v49 = vpop.f32.mrb[4].mxu1  ;;  %v5638_v52 = vpop.f32.mrb[5].mxu0 }
 0x1ba   : > { %v5640_v53 = vpop.f32.mrb[5].mxu1 }
 0x1c3   : > { %v5642_v1 = vpop.f32.mrb[6].mxu0 }
 0x1c4   : > { %v5644_v7 = vpop.f32.mrb[6].mxu1  ;;  %v5646_v12 = vpop.f32.mrb[7].mxu0 }
 0x1c5   : > { %v5648_v14 = vpop.f32.mrb[7].mxu1 }
 0x1ce   : > { %v3395_v15 = vpop.f32.mrb[8].mxu0 }
 0x1cf   : > { %v4252_v20 = vmul.f32 -1.442695, %v3395_v15  ;;  %v3466_v27 = vpop.f32.mrb[8].mxu1  ;;  %v3397_v29 = vpop.f32.mrb[9].mxu0 }
 0x1d0   : > { %v4254_v47 = vmul.f32 -1.442695, %v3466_v27  ;;  %v4253_v57 = vmul.f32 -1.442695, %v3397_v29  ;;  %v3468_v61 = vpop.f32.mrb[9].mxu1 }
 0x1d1   : > { %4729 = vpow2.f32 %v4252_v20  ;;  %v4255_v62 = vmul.f32 -1.442695, %v3468_v61 }
 0x1d2   : > { %4731 = vpow2.f32 %v4254_v47 }
 0x1d3   : > { %4733 = vpow2.f32 %v4253_v57 }
 0x1d4   : > { %4735 = vpow2.f32 %v4255_v62 }
 0x1d9   : > { %v3537_v63 = vpop.f32.mrb[10].mxu0 }
 0x1da   : > { %v4256_v5 = vmul.f32 -1.442695, %v3537_v63  ;;  %v3608_v16 = vpop.f32.mrb[10].mxu1  ;;  %v3539_v19 = vpop.f32.mrb[11].mxu0 }
 0x1db   : > { %v4730_v3 = vpop.eup %4729  ;;  %v4258_v10 = vmul.f32 -1.442695, %v3608_v16  ;;  %v3610_v43 = vpop.f32.mrb[11].mxu1  ;;  %v4257_v25 = vmul.f32 -1.442695, %v3539_v19 }
 0x1dc   : > { %v4732_v11 = vpop.eup %4731  ;;  %v3961_v23 = vadd.f32 1.0, %v4730_v3  ;;  %4737 = vpow2.f32 %v4256_v5  ;;  %v4259_v28 = vmul.f32 -1.442695, %v3610_v43 }
 0x1dd   : > { %v4734_v4 = vpop.eup %4733  ;;  %v3963_v9 = vadd.f32 1.0, %v4732_v11  ;;  %4739 = vpow2.f32 %v4258_v10 }
 0x1de   : > { %v4736_v17 = vpop.eup %4735  ;;  %4741 = vrcp.f32 %v3961_v23  ;;  %v3962_v22 = vadd.f32 1.0, %v4734_v4 }
 0x1df   : > { %4743 = vrcp.f32 %v3963_v9  ;;  %v3964_v26 = vadd.f32 1.0, %v4736_v17 }
 0x1e0   : > { %4745 = vrcp.f32 %v3962_v22 }
 0x1e1   : > { %4747 = vrcp.f32 %v3964_v26 }
 0x1e2   : > { %4749 = vpow2.f32 %v4257_v25 }
 0x1e3   : > { %4751 = vpow2.f32 %v4259_v28 }
 0x1e4   : > { %v3679_v39 = vpop.f32.mrb[12].mxu0 }
 0x1e5   : > { %v4260_v54 = vmul.f32 -1.442695, %v3679_v39  ;;  %v3750_v55 = vpop.f32.mrb[12].mxu1  ;;  %v3681_v58 = vpop.f32.mrb[13].mxu0 }
 0x1e6   : > { %v4738_v6 = vpop.eup %4737  ;;  %v4262_v30 = vmul.f32 -1.442695, %v3750_v55  ;;  %v3752_v31 = vpop.f32.mrb[13].mxu1  ;;  %v4261_v21 = vmul.f32 -1.442695, %v3681_v58 }
 0x1e7   : > { %v4740_v34 = vpop.eup %4739  ;;  %v3965_v56 = vadd.f32 1.0, %v4738_v6  ;;  %4753 = vpow2.f32 %v4260_v54  ;;  %v4263_v36 = vmul.f32 -1.442695, %v3752_v31 }
 0x1e8   : > { %v4742_v32 = vpop.eup %4741  ;;  %v3967_v33 = vadd.f32 1.0, %v4740_v34  ;;  %4755 = vpow2.f32 %v4262_v30 }
 0x1e9   : > { %v4744_v37 = vpop.eup %4743  ;;  %v4009_v38 = vmul.f32 %v4742_v32, %v5618_v0  ;;  %4757 = vrcp.f32 %v3965_v56 }
 0x1ea   : > { %v4746_v41 = vpop.eup %4745  ;;  %v4011_v42 = vmul.f32 %v4744_v37, %v5620_v13  ;;  %4759 = vrcp.f32 %v3967_v33 }
 0x1eb   : > { %v4748_v48 = vpop.eup %4747  ;;  %4025 = vst [vmem:[%s5654_s6] sm:$0xff] %v4009_v38  ;;  %v4010_v50 = vmul.f32 %v4746_v41, %v5622_v18  ;;  %4761 = vpow2.f32 %v4261_v21 }
 0x1ec   : > { %v4750_v51 = vpop.eup %4749  ;;  %4027 = vst [vmem:[%s5654_s6 + $0x10] sm:$0xff] %v4011_v42  ;;  %v4012_v59 = vmul.f32 %v4748_v48, %v5624_v24  ;;  %4763 = vpow2.f32 %v4263_v36 }
 0x1ed   : > { %v4752_v60 = vpop.eup %4751  ;;  %4026 = vst [vmem:[%s5654_s6 + $0x8] sm:$0xff] %v4010_v50  ;;  %v3966_v2 = vadd.f32 1.0, %v4750_v51 }
 0x1ee   : > { %4028 = vst [vmem:[%s5654_s6 + $0x18] sm:$0xff] %v4012_v59  ;;  %v3968_v8 = vadd.f32 1.0, %v4752_v60 }
 0x1ef   : > { %4765 = vrcp.f32 %v3966_v2  ;;  %v3821_v0 = vpop.f32.mrb[14].mxu0 }
 0x1f0   : > { %4767 = vrcp.f32 %v3968_v8  ;;  %v4264_v13 = vmul.f32 -1.442695, %v3821_v0  ;;  %v3892_v15 = vpop.f32.mrb[14].mxu1  ;;  %v3823_v20 = vpop.f32.mrb[15].mxu0 }
 0x1f1   : > { %v4754_v27 = vpop.eup %4753  ;;  %v4266_v29 = vmul.f32 -1.442695, %v3892_v15  ;;  %v3894_v18 = vpop.f32.mrb[15].mxu1  ;;  %v4265_v24 = vmul.f32 -1.442695, %v3823_v20 }
 0x1f2   : > { %v4756_v47 = vpop.eup %4755  ;;  %v3969_v57 = vadd.f32 1.0, %v4754_v27  ;;  %4769 = vpow2.f32 %v4264_v13  ;;  %v4267_v63 = vmul.f32 -1.442695, %v3894_v18 }
 0x1f3   : > { %v4758_v61 = vpop.eup %4757  ;;  %v3971_v62 = vadd.f32 1.0, %v4756_v47  ;;  %4771 = vpow2.f32 %v4266_v29 }
 0x1f4   : > { %v4760_v5 = vpop.eup %4759  ;;  %v4013_v16 = vmul.f32 %v4758_v61, %v5626_v35  ;;  %4773 = vrcp.f32 %v3969_v57 }
 0x1f5   : > { %v4762_v19 = vpop.eup %4761  ;;  %v4015_v3 = vmul.f32 %v4760_v5, %v5628_v40  ;;  %4775 = vrcp.f32 %v3971_v62 }
 0x1f6   : > { %v4764_v10 = vpop.eup %4763  ;;  %4029 = vst [vmem:[%s5654_s6 + $0x20] sm:$0xff] %v4013_v16  ;;  %v3970_v43 = vadd.f32 1.0, %v4762_v19  ;;  %4777 = vpow2.f32 %v4265_v24 }
 0x1f7   : > { %4031 = vst [vmem:[%s5654_s6 + $0x30] sm:$0xff] %v4015_v3  ;;  %v3972_v11 = vadd.f32 1.0, %v4764_v10  ;;  %4779 = vpow2.f32 %v4267_v63 }
 0x1f8   : > { %4781 = vrcp.f32 %v3970_v43 }
 0x1f9   : > { %v4766_v23 = vpop.eup %4765  ;;  %4783 = vrcp.f32 %v3972_v11 }
 0x1fa   : > { %v4768_v4 = vpop.eup %4767  ;;  %v4014_v35 = vmul.f32 %v4766_v23, %v5630_v44 }
 0x1fb   : > { %v4016_v9 = vmul.f32 %v4768_v4, %v5632_v45 }
 0x1fc   : > { %v4770_v40 = vpop.eup %4769  ;;  %4030 = vst [vmem:[%s5654_s6 + $0x28] sm:$0xff] %v4014_v35 }
 0x1fd   : > { %v4772_v17 = vpop.eup %4771  ;;  %4032 = vst [vmem:[%s5654_s6 + $0x38] sm:$0xff] %v4016_v9  ;;  %v3973_v22 = vadd.f32 1.0, %v4770_v40 }
 0x1fe   : > { %v4774_v25 = vpop.eup %4773  ;;  %v3975_v26 = vadd.f32 1.0, %v4772_v17 }
 0x1ff   : > { %v4776_v28 = vpop.eup %4775  ;;  %v4017_v39 = vmul.f32 %v4774_v25, %v5634_v46  ;;  %4785 = vrcp.f32 %v3973_v22 }
 0x200   : > { %v4778_v54 = vpop.eup %4777  ;;  %v4019_v44 = vmul.f32 %v4776_v28, %v5636_v49  ;;  %4787 = vrcp.f32 %v3975_v26 }
 0x201   : > { %v4780_v55 = vpop.eup %4779  ;;  %4033 = vst [vmem:[%s5654_s6 + $0x40] sm:$0xff] %v4017_v39  ;;  %v3974_v45 = vadd.f32 1.0, %v4778_v54 }
 0x202   : > { %v4782_v58 = vpop.eup %4781  ;;  %4035 = vst [vmem:[%s5654_s6 + $0x50] sm:$0xff] %v4019_v44  ;;  %v3976_v6 = vadd.f32 1.0, %v4780_v55 }
 0x203   : > { %v4784_v30 = vpop.eup %4783  ;;  %v4018_v31 = vmul.f32 %v4782_v58, %v5638_v52  ;;  %4789 = vrcp.f32 %v3974_v45 }
 0x204   : > { %v4020_v46 = vmul.f32 %v4784_v30, %v5640_v53  ;;  %4791 = vrcp.f32 %v3976_v6 }
 0x205   : > { %4034 = vst [vmem:[%s5654_s6 + $0x48] sm:$0xff] %v4018_v31 }
 0x206   : > { %4036 = vst [vmem:[%s5654_s6 + $0x58] sm:$0xff] %v4020_v46 }
 0x209   : > { %v4786_v49 = vpop.eup %4785 }
 0x20a   : > { %v4788_v34 = vpop.eup %4787  ;;  %v4021_v56 = vmul.f32 %v4786_v49, %v5642_v1 }
 0x20b   : > { %v4023_v21 = vmul.f32 %v4788_v34, %v5644_v7 }
 0x20c   : > { %4037 = vst [vmem:[%s5654_s6 + $0x60] sm:$0xff] %v4021_v56 }
 0x20d   : > { %v4790_v32 = vpop.eup %4789  ;;  %4039 = vst [vmem:[%s5654_s6 + $0x70] sm:$0xff] %v4023_v21 }
 0x20e   : > { %v4792_v33 = vpop.eup %4791  ;;  %v4022_v52 = vmul.f32 %v4790_v32, %v5646_v12 }
 0x20f   : > { %v4024_v36 = vmul.f32 %v4792_v33, %v5648_v14 }
 0x210   : > { %4038 = vst [vmem:[%s5654_s6 + $0x68] sm:$0xff] %v4022_v52 }
 0x211   : > { %4040 = vst [vmem:[%s5654_s6 + $0x78] sm:$0xff] %v4024_v36 }
 0x212 PF: > { %s13_s12 = sadd.s32 1, %s4799_s12  }
 0x213   : > { %p10_p4 = scmp.ge.s32.totalorder %s13_s12, 4  }
 0x215   :  { %12 = sbr.rel (!%p10_p4) target bundleno = 1 (0x1), region = 66 }

</bundles_post_ra>
